<compile_context>
chip_gen: v7x
topology: tpu7x:2x2x1
jax: 0.10.0
libtpu: 0.0.40
codegen_flags: <defaults>
</compile_context>

<pallas_src>
import functools

import jax
import jax.numpy as jnp
from jax.experimental import pallas as pl
from jax.experimental.pallas import tpu as pltpu

NEG_SLOPE = 0.01   # PyTorch nn.LeakyReLU default
LN_EPS = 1e-5      # PyTorch nn.LayerNorm default
SUBLANE = 8


def _round_up(x, m):
    return ((x + m - 1) // m) * m


def _layernorm(h, gamma, beta):
    # Single-pass moments: one fewer reduction/pass over h than the two-pass form.
    mu = jnp.mean(h, axis=-1, keepdims=True)
    ms = jnp.mean(h * h, axis=-1, keepdims=True)
    var = jnp.maximum(ms - mu * mu, 0.0)
    return (h - mu) * jax.lax.rsqrt(var + LN_EPS) * gamma + beta


def _leaky_relu(h):
    return jnp.maximum(h, NEG_SLOPE * h)


def traj_pred_mlp_kernel(x_ref, w1_ref, w2_ref, w3_ref, p_ref, o_ref,
                         *, hidden, d_out):
    """Fused MLP hot path: 3 matmuls + 2 layernorms + 2 leaky-relus, all in VMEM.

    p_ref is the packed parameter block:
      row 0: b1, row 1: g1, row 2: be1, row 3: b2, row 4: g2, row 5: be2
      (first `hidden` lanes valid), row 6: b3 (first `d_out` lanes valid).
    """
    x = x_ref[...].astype(jnp.float32)
    p = p_ref[...].astype(jnp.float32)

    b1, g1, be1 = p[0:1, :hidden], p[1:2, :hidden], p[2:3, :hidden]
    b2, g2, be2 = p[3:4, :hidden], p[4:5, :hidden], p[5:6, :hidden]
    b3 = p[6:7, :d_out]

    # Linear 1 + LayerNorm + LeakyReLU
    h = jnp.dot(x, w1_ref[...], preferred_element_type=jnp.float32) + b1
    h = _leaky_relu(_layernorm(h, g1, be1))

    # Linear 2 + LayerNorm + LeakyReLU
    h = jnp.dot(h, w2_ref[...], preferred_element_type=jnp.float32) + b2
    h = _leaky_relu(_layernorm(h, g2, be2))

    # Linear 3 (output head, true width — no lane padding)
    o = jnp.dot(h, w3_ref[...], preferred_element_type=jnp.float32) + b3
    o_ref[...] = o.astype(o_ref.dtype)


def init_params(key, in_channels, out_channels, hidden_unit, dtype=jnp.float32):
    """Deterministic synthetic parameters, same shapes as the PyTorch module."""
    ks = jax.random.split(key, 6)

    def linear(kw, kb, fan_in, fan_out):
        bound = 1.0 / (fan_in ** 0.5)
        w = jax.random.uniform(kw, (fan_out, fan_in), dtype, -bound, bound)  # torch layout (out, in)
        b = jax.random.uniform(kb, (fan_out,), dtype, -bound, bound)
        return w, b

    w1, b1 = linear(ks[0], ks[1], in_channels, hidden_unit)
    w2, b2 = linear(ks[2], ks[3], hidden_unit, hidden_unit)
    w3, b3 = linear(ks[4], ks[5], hidden_unit, out_channels)
    g1 = jnp.ones((hidden_unit,), dtype)
    be1 = jnp.zeros((hidden_unit,), dtype)
    g2 = jnp.ones((hidden_unit,), dtype)
    be2 = jnp.zeros((hidden_unit,), dtype)
    return dict(w1=w1, b1=b1, g1=g1, be1=be1,
                w2=w2, b2=b2, g2=g2, be2=be2,
                w3=w3, b3=b3)


def _device_caps():
    """Per-generation (max_tile_rows, is_multicore).

    Caps keep double-buffered f32 blocks (lane-padded to 128 in VMEM) comfortably
    inside the default scoped-VMEM budget: ~7 MiB at tb=2048, ~15 MiB at tb=4096.
    """
    try:
        kind = jax.devices()[0].device_kind.lower()
    except Exception:
        kind = ""
    is_v5e = ("v5e" in kind) or ("v5 lite" in kind) or ("v5litepod" in kind)
    is_v6 = "v6" in kind
    is_v7 = "v7" in kind
    if is_v6 or is_v7:
        cap = 4096          # 32 MiB scoped-VMEM default on v6e/v7x
    elif is_v5e:
        cap = 2048          # 16 MiB scoped-VMEM default on v5e
    else:
        cap = 2048          # unknown chip: be conservative
    return cap, is_v7


def _choose_tiling(batch, cap, multicore):
    """Pick (tile_b, grid). tile_b is a multiple of 8 unless it equals `batch`."""
    if not multicore:
        # Single TensorCore: fewest steps possible (no forced split).
        if batch <= cap:
            return batch, 1
        return cap, pl.cdiv(batch, cap)
    # v7x: the grid axis is sharded across 2 TensorCores -> want >=2, even steps.
    if batch <= 2 * SUBLANE:
        return batch, 1     # too small to split usefully
    tb = min(cap, _round_up(pl.cdiv(batch, 2), SUBLANE))
    grid = pl.cdiv(batch, tb)
    if grid > 2 and grid % 2 == 1:   # avoid one core doing an extra step
        tb = max(SUBLANE, _round_up(pl.cdiv(batch, grid + 1), SUBLANE))
        grid = pl.cdiv(batch, tb)
    return tb, grid


@jax.jit
def traj_pred_mlp(x, params):
    """x: [B, in_channels] -> [B, out_channels]."""
    B, D_in = x.shape
    H = params["w1"].shape[0]
    D_out = params["w3"].shape[0]
    W = max(H, D_out)                 # packed-parameter width

    # --- glue: pre-transpose weights to (in, out); no lane padding anywhere.
    w1 = params["w1"].T.astype(jnp.float32)    # [D_in, H]
    w2 = params["w2"].T.astype(jnp.float32)    # [H, H]
    w3 = params["w3"].T.astype(jnp.float32)    # [H, D_out]

    # --- pack the 7 small parameter vectors into one [8, W] block.
    packed = jnp.zeros((SUBLANE, W), jnp.float32)
    for r, name in enumerate(("b1", "g1", "be1", "b2", "g2", "be2")):
        packed = packed.at[r, :H].set(params[name].astype(jnp.float32))
    packed = packed.at[6, :D_out].set(params["b3"].astype(jnp.float32))

    # --- batch tiling: no jnp.pad; Pallas masks the partial last block.
    cap, multicore = _device_caps()
    tb, grid = _choose_tiling(B, cap, multicore)

    full = lambda shape: pl.BlockSpec(shape, lambda i: (0, 0))
    kernel = functools.partial(traj_pred_mlp_kernel, hidden=H, d_out=D_out)

    cost = pl.CostEstimate(
        flops=2 * B * (D_in * H + H * H + H * D_out),
        transcendentals=2 * B,                                   # one rsqrt per row per LN
        bytes_accessed=4 * (B * (D_in + D_out)
                            + D_in * H + H * H + H * D_out + SUBLANE * W),
    )

    out = pl.pallas_call(
        kernel,
        out_shape=jax.ShapeDtypeStruct((B, D_out), x.dtype),
        grid_spec=pltpu.PrefetchScalarGridSpec(
            num_scalar_prefetch=0,
            grid=(grid,),
            in_specs=[
                pl.BlockSpec((tb, D_in), lambda i: (i, 0)),   # x tile
                full((D_in, H)),                              # w1
                full((H, H)),                                 # w2
                full((H, D_out)),                             # w3 (true width)
                full((SUBLANE, W)),                           # packed biases / LN params
            ],
            out_specs=pl.BlockSpec((tb, D_out), lambda i: (i, 0)),
        ),
        compiler_params=pltpu.CompilerParams(
            dimension_semantics=("parallel",)),
        cost_estimate=cost,
    )(x, w1, w2, w3, packed)

    return out


def reference_mlp(x, params):
    """Pure-JAX reference matching the PyTorch forward."""
    h = x @ params["w1"].T + params["b1"]
    h = _leaky_relu(_layernorm(h, params["g1"], params["be1"]))
    h = h @ params["w2"].T + params["b2"]
    h = _leaky_relu(_layernorm(h, params["g2"], params["be2"]))
    return h @ params["w3"].T + params["b3"]


if __name__ == "__main__":
    in_channels, out_channels, hidden_unit = 16, 30, 32
    B = 16

    key = jax.random.PRNGKey(0)
    kx, kp = jax.random.split(key)
    x = jax.random.normal(kx, (B, in_channels), jnp.float32)
    params = init_params(kp, in_channels, out_channels, hidden_unit)

    out = traj_pred_mlp(x, params)
    out = jax.block_until_ready(out)

    ref = reference_mlp(x, params)
    assert out.shape == (B, out_channels)
    assert jnp.allclose(out, ref, atol=1e-4, rtol=1e-4), "mismatch vs reference"

    print("KERNEL_OK")
</pallas_src>

<mosaic_0001>
module attributes {stable_mosaic.version = 11 : i64} {
  func.func @traj_pred_mlp_kernel(%arg0: i32, %arg1: memref<16x16xf32, #tpu.memory_space<vmem>>, %arg2: memref<16x32xf32, #tpu.memory_space<vmem>>, %arg3: memref<32x32xf32, #tpu.memory_space<vmem>>, %arg4: memref<32x30xf32, #tpu.memory_space<vmem>>, %arg5: memref<8x32xf32, #tpu.memory_space<vmem>>, %arg6: memref<16x30xf32, #tpu.memory_space<vmem>>) attributes {dimension_semantics = [#tpu.dimension_semantics<parallel>], iteration_bounds = array<i64: 1>, scalar_prefetch = 0 : i64, scratch_operands = 0 : i64, tpu.core_type = #tpu.core_type<tc>, window_params = [{transform_indices = @transform_0, window_bounds = array<i64: 16, 16>}, {pipeline_mode = #tpu.pipeline_mode<synchronous>, transform_indices = @transform_1, window_bounds = array<i64: 16, 32>}, {pipeline_mode = #tpu.pipeline_mode<synchronous>, transform_indices = @transform_2, window_bounds = array<i64: 32, 32>}, {pipeline_mode = #tpu.pipeline_mode<synchronous>, transform_indices = @transform_3, window_bounds = array<i64: 32, 30>}, {pipeline_mode = #tpu.pipeline_mode<synchronous>, transform_indices = @transform_4, window_bounds = array<i64: 8, 32>}, {transform_indices = @transform_5, window_bounds = array<i64: 16, 30>}]} {
    %c0 = arith.constant 0 : index
    %c0_0 = arith.constant 0 : index
    %0 = vector.load %arg1[%c0, %c0_0] : memref<16x16xf32, #tpu.memory_space<vmem>>, vector<16x16xf32>
    %c0_1 = arith.constant 0 : index
    %c0_2 = arith.constant 0 : index
    %1 = vector.load %arg5[%c0_1, %c0_2] : memref<8x32xf32, #tpu.memory_space<vmem>>, vector<8x32xf32>
    %2 = vector.extract_strided_slice %1 {offsets = [0, 0], sizes = [1, 32], strides = [1, 1]} : vector<8x32xf32> to vector<1x32xf32>
    %3 = vector.extract_strided_slice %1 {offsets = [1, 0], sizes = [1, 32], strides = [1, 1]} : vector<8x32xf32> to vector<1x32xf32>
    %4 = vector.extract_strided_slice %1 {offsets = [2, 0], sizes = [1, 32], strides = [1, 1]} : vector<8x32xf32> to vector<1x32xf32>
    %5 = vector.extract_strided_slice %1 {offsets = [3, 0], sizes = [1, 32], strides = [1, 1]} : vector<8x32xf32> to vector<1x32xf32>
    %6 = vector.extract_strided_slice %1 {offsets = [4, 0], sizes = [1, 32], strides = [1, 1]} : vector<8x32xf32> to vector<1x32xf32>
    %7 = vector.extract_strided_slice %1 {offsets = [5, 0], sizes = [1, 32], strides = [1, 1]} : vector<8x32xf32> to vector<1x32xf32>
    %8 = vector.extract_strided_slice %1 {offsets = [6, 0], sizes = [1, 30], strides = [1, 1]} : vector<8x32xf32> to vector<1x30xf32>
    %c0_3 = arith.constant 0 : index
    %c0_4 = arith.constant 0 : index
    %9 = vector.load %arg2[%c0_3, %c0_4] : memref<16x32xf32, #tpu.memory_space<vmem>>, vector<16x32xf32>
    %cst = arith.constant dense<0.000000e+00> : vector<16x32xf32>
    %10 = tpu.matmul %0, %9, %cst {dimension_numbers = #tpu.dot_dimension_numbers<[1], [0], [0], [1], [0, 0, 1, 1], [], []>} : vector<16x16xf32>, vector<16x32xf32>, vector<16x32xf32> -> vector<16x32xf32>
    %11 = vector.broadcast %2 : vector<1x32xf32> to vector<16x32xf32>
    %12 = arith.addf %10, %11 : vector<16x32xf32>
    %cst_5 = arith.constant dense<0.000000e+00> : vector<16xf32>
    %13 = vector.multi_reduction <add>, %12, %cst_5 [1] : vector<16x32xf32> to vector<16xf32>
    %14 = vector.shape_cast %13 : vector<16xf32> to vector<16x1xf32>
    %cst_6 = arith.constant 3.200000e+01 : f32
    %15 = vector.broadcast %cst_6 : f32 to vector<16x1xf32>
    %16 = arith.divf %14, %15 : vector<16x1xf32>
    %17 = arith.mulf %12, %12 : vector<16x32xf32>
    %cst_7 = arith.constant dense<0.000000e+00> : vector<16xf32>
    %18 = vector.multi_reduction <add>, %17, %cst_7 [1] : vector<16x32xf32> to vector<16xf32>
    %19 = vector.shape_cast %18 : vector<16xf32> to vector<16x1xf32>
    %cst_8 = arith.constant 3.200000e+01 : f32
    %20 = vector.broadcast %cst_8 : f32 to vector<16x1xf32>
    %21 = arith.divf %19, %20 : vector<16x1xf32>
    %22 = arith.mulf %16, %16 : vector<16x1xf32>
    %23 = arith.subf %21, %22 : vector<16x1xf32>
    %cst_9 = arith.constant 0.000000e+00 : f32
    %24 = vector.broadcast %cst_9 : f32 to vector<16x1xf32>
    %25 = arith.maximumf %23, %24 : vector<16x1xf32>
    %26 = vector.broadcast %16 : vector<16x1xf32> to vector<16x32xf32>
    %27 = arith.subf %12, %26 : vector<16x32xf32>
    %cst_10 = arith.constant 9.99999974E-6 : f32
    %28 = vector.broadcast %cst_10 : f32 to vector<16x1xf32>
    %29 = arith.addf %25, %28 : vector<16x1xf32>
    %30 = math.rsqrt %29 : vector<16x1xf32>
    %31 = vector.broadcast %30 : vector<16x1xf32> to vector<16x32xf32>
    %32 = arith.mulf %27, %31 : vector<16x32xf32>
    %33 = vector.broadcast %3 : vector<1x32xf32> to vector<16x32xf32>
    %34 = arith.mulf %32, %33 : vector<16x32xf32>
    %35 = vector.broadcast %4 : vector<1x32xf32> to vector<16x32xf32>
    %36 = arith.addf %34, %35 : vector<16x32xf32>
    %cst_11 = arith.constant 0.00999999977 : f32
    %37 = vector.broadcast %cst_11 : f32 to vector<16x32xf32>
    %38 = arith.mulf %37, %36 : vector<16x32xf32>
    %39 = arith.maximumf %36, %38 : vector<16x32xf32>
    %c0_12 = arith.constant 0 : index
    %c0_13 = arith.constant 0 : index
    %40 = vector.load %arg3[%c0_12, %c0_13] : memref<32x32xf32, #tpu.memory_space<vmem>>, vector<32x32xf32>
    %cst_14 = arith.constant dense<0.000000e+00> : vector<16x32xf32>
    %41 = tpu.matmul %39, %40, %cst_14 {dimension_numbers = #tpu.dot_dimension_numbers<[1], [0], [0], [1], [0, 0, 1, 1], [], []>} : vector<16x32xf32>, vector<32x32xf32>, vector<16x32xf32> -> vector<16x32xf32>
    %42 = vector.broadcast %5 : vector<1x32xf32> to vector<16x32xf32>
    %43 = arith.addf %41, %42 : vector<16x32xf32>
    %cst_15 = arith.constant dense<0.000000e+00> : vector<16xf32>
    %44 = vector.multi_reduction <add>, %43, %cst_15 [1] : vector<16x32xf32> to vector<16xf32>
    %45 = vector.shape_cast %44 : vector<16xf32> to vector<16x1xf32>
    %cst_16 = arith.constant 3.200000e+01 : f32
    %46 = vector.broadcast %cst_16 : f32 to vector<16x1xf32>
    %47 = arith.divf %45, %46 : vector<16x1xf32>
    %48 = arith.mulf %43, %43 : vector<16x32xf32>
    %cst_17 = arith.constant dense<0.000000e+00> : vector<16xf32>
    %49 = vector.multi_reduction <add>, %48, %cst_17 [1] : vector<16x32xf32> to vector<16xf32>
    %50 = vector.shape_cast %49 : vector<16xf32> to vector<16x1xf32>
    %cst_18 = arith.constant 3.200000e+01 : f32
    %51 = vector.broadcast %cst_18 : f32 to vector<16x1xf32>
    %52 = arith.divf %50, %51 : vector<16x1xf32>
    %53 = arith.mulf %47, %47 : vector<16x1xf32>
    %54 = arith.subf %52, %53 : vector<16x1xf32>
    %cst_19 = arith.constant 0.000000e+00 : f32
    %55 = vector.broadcast %cst_19 : f32 to vector<16x1xf32>
    %56 = arith.maximumf %54, %55 : vector<16x1xf32>
    %57 = vector.broadcast %47 : vector<16x1xf32> to vector<16x32xf32>
    %58 = arith.subf %43, %57 : vector<16x32xf32>
    %cst_20 = arith.constant 9.99999974E-6 : f32
    %59 = vector.broadcast %cst_20 : f32 to vector<16x1xf32>
    %60 = arith.addf %56, %59 : vector<16x1xf32>
    %61 = math.rsqrt %60 : vector<16x1xf32>
    %62 = vector.broadcast %61 : vector<16x1xf32> to vector<16x32xf32>
    %63 = arith.mulf %58, %62 : vector<16x32xf32>
    %64 = vector.broadcast %6 : vector<1x32xf32> to vector<16x32xf32>
    %65 = arith.mulf %63, %64 : vector<16x32xf32>
    %66 = vector.broadcast %7 : vector<1x32xf32> to vector<16x32xf32>
    %67 = arith.addf %65, %66 : vector<16x32xf32>
    %cst_21 = arith.constant 0.00999999977 : f32
    %68 = vector.broadcast %cst_21 : f32 to vector<16x32xf32>
    %69 = arith.mulf %68, %67 : vector<16x32xf32>
    %70 = arith.maximumf %67, %69 : vector<16x32xf32>
    %c0_22 = arith.constant 0 : index
    %c0_23 = arith.constant 0 : index
    %71 = vector.load %arg4[%c0_22, %c0_23] : memref<32x30xf32, #tpu.memory_space<vmem>>, vector<32x30xf32>
    %cst_24 = arith.constant dense<0.000000e+00> : vector<16x30xf32>
    %72 = tpu.matmul %70, %71, %cst_24 {dimension_numbers = #tpu.dot_dimension_numbers<[1], [0], [0], [1], [0, 0, 1, 1], [], []>} : vector<16x32xf32>, vector<32x30xf32>, vector<16x30xf32> -> vector<16x30xf32>
    %73 = vector.broadcast %8 : vector<1x30xf32> to vector<16x30xf32>
    %74 = arith.addf %72, %73 : vector<16x30xf32>
    %c0_25 = arith.constant 0 : index
    %c0_26 = arith.constant 0 : index
    %75 = vector.load %arg6[%c0_25, %c0_26] : memref<16x30xf32, #tpu.memory_space<vmem>>, vector<16x30xf32>
    tpu.vector_store %arg6[%c0_25, %c0_26], %74 {strides = array<i32>} : memref<16x30xf32, #tpu.memory_space<vmem>>, vector<16x30xf32>,
    return
  }
  func.func @transform_0(%arg0: i32) -> (i32, i32) {
    %c0_i32 = arith.constant 0 : i32
    %c0_i32_0 = arith.constant 0 : i32
    return %arg0, %c0_i32 : i32, i32
  }
  func.func @transform_1(%arg0: i32) -> (i32, i32) {
    %c0_i32 = arith.constant 0 : i32
    %c0_i32_0 = arith.constant 0 : i32
    %c0_i32_1 = arith.constant 0 : i32
    return %c0_i32, %c0_i32_0 : i32, i32
  }
  func.func @transform_2(%arg0: i32) -> (i32, i32) {
    %c0_i32 = arith.constant 0 : i32
    %c0_i32_0 = arith.constant 0 : i32
    %c0_i32_1 = arith.constant 0 : i32
    return %c0_i32, %c0_i32_0 : i32, i32
  }
  func.func @transform_3(%arg0: i32) -> (i32, i32) {
    %c0_i32 = arith.constant 0 : i32
    %c0_i32_0 = arith.constant 0 : i32
    %c0_i32_1 = arith.constant 0 : i32
    return %c0_i32, %c0_i32_0 : i32, i32
  }
  func.func @transform_4(%arg0: i32) -> (i32, i32) {
    %c0_i32 = arith.constant 0 : i32
    %c0_i32_0 = arith.constant 0 : i32
    %c0_i32_1 = arith.constant 0 : i32
    return %c0_i32, %c0_i32_0 : i32, i32
  }
  func.func @transform_5(%arg0: i32) -> (i32, i32) {
    %c0_i32 = arith.constant 0 : i32
    %c0_i32_0 = arith.constant 0 : i32
    return %arg0, %c0_i32 : i32, i32
  }
}

</mosaic_0001>

<bundles_post_ra>
// kernel: traj_pred_mlp.1
= control target key start
LH: loop header
LB: loop body
LE: loop exit
PB: predicated region body
PF: predicated region fallthrough
CT: control target
= control target key end

     0   :  { %vm30_vm0 = vcmask 130048   ;;  %s627_s0 = inlined_call_operand.vmem [shape: f32[16,16], index: 0, kind: input, shape index: {}]   ;;  %s628_s1 = inlined_call_operand.vmem [shape: f32[16,32], index: 1, kind: input, shape index: {}]   ;;  %s629_s2 = inlined_call_operand.vmem [shape: f32[32,32], index: 2, kind: input, shape index: {}]   ;;  %s630_s3 = inlined_call_operand.vmem [shape: f32[32,30], index: 3, kind: input, shape index: {}]   ;;  %s631_s4 = inlined_call_operand.vmem [shape: f32[8,32], index: 4, kind: input, shape index: {}]   ;;  %s632_s5 = inlined_call_operand.hbm [shape: f32[16,30], index: 5, kind: output, shape index: {}]  }
   0x1   :  { %v24_v0 = vld [vmem:[%s628_s1] sm:$0xff]  ;;  %v25_v1 = vld [vmem:[%s628_s1 + $0x8] sm:$0xff] }
   0x2   :  { %v21_v2 = vld [vmem:[%s627_s0] sm:$0xff]  ;;  %v458_v3 = vpack.c.bf16 %v25_v1, %v24_v0 }
   0x3   :  { %433 = vmatprep.mubr.msk.f32.mxu0 %vm30_vm0, %v21_v2 }
   0x4   :  { %10 = vsyncpa [#allocation3], 0  ;;  %459 = vmatprep.subr.bf16.mxu0 %v458_v3  ;;  %v22_v4 = vld [vmem:[%s627_s0 + $0x8] sm:$0xff]  ;;  %v26_v5 = vlaneseq  ;;  %v564_v8 = vld [vmem:[%s631_s4] sm:$0xff]  ;;  %vm112_vm1 = vcmask 261120   ;;  %vm388_vm2 = vcmask 244736  }
   0x5   :  { %461 = vmatpush3.bf16.msra.mxu0 %v458_v3  ;;  %v162_v20 = vld [vmem:[%s629_s2] sm:$0xff]  ;;  %v163_v21 = vld [vmem:[%s629_s2 + $0x8] sm:$0xff]  ;;  %v164_v22 = vld [vmem:[%s629_s2 + $0x10] sm:$0xff] }
   0x6   :  { %v558_v6 = vshrl.u32 %v26_v5, 7  ;;  %v462_v23 = vpack.c.bf16 %v163_v21, %v162_v20  ;;  %v165_v24 = vld [vmem:[%s629_s2 + $0x18] sm:$0xff] }
   0x7   :  { %v466_v25 = vpack.c.bf16 %v165_v24, %v164_v22 }
   0x8   :  { %434 = vmatmul.mubr.msk.f32.vlgmr.msra.gmra.mrb[0].mxu0 %vm30_vm0, %v22_v4  ;;  %v28_v7 = vsub.s32 0, %v558_v6  ;;  %463 = vmatprep.subr.bf16.mxu1 %v462_v23  ;;  %v148_v42 = vsub.s32 1, %v558_v6  ;;  %v154_v43 = vsub.s32 2, %v558_v6  ;;  %v168_v60 = vsub.s32 3, %v558_v6 }
   0x9   :  { %465 = vmatpush3.bf16.msra.mxu1 %v462_v23 }
   0xa   :  { %v29_v9 = vrot.slane %v564_v8, %v28_v7  ;;  %467 = vmatprep.subr.bf16.mxu1 %v466_v25  ;;  %v149_v45 = vrot.slane %v564_v8, %v148_v42  ;;  %v155_v48 = vrot.slane %v564_v8, %v154_v43  ;;  %v169_v61 = vrot.slane %v564_v8, %v168_v60 }
   0xd   :  { %469 = vmatpush3.bf16.msra.mxu1 %v466_v25 }
  0xdb   :  { %v435_v10 = vpop.f32.mrb[0].mxu0 }
  0xdc   :  { %v103_v11 = vpop.f32.mrb[1].mxu0  ;;  %v109_v12 = vadd.f32 %v435_v10, %v29_v9  ;;  %v299_v10 = vld [vmem:[%s630_s3] sm:$0xff] }
  0xdd   :  { %v104_v13 = vadd.f32 %v103_v11, %v29_v9  ;;  %v300_v11 = vld [vmem:[%s630_s3 + $0x8] sm:$0xff] }
  0xde   :  { %v123_v17 = vmul.f32 %v109_v12, %v109_v12  ;;  %v116_v18 = vsel %vm112_vm1, %v109_v12, 0.0 }
  0xdf   :  { %v113_v14 = vsel %vm112_vm1, %v104_v13, 0.0  ;;  %v122_v15 = vmul.f32 %v104_v13, %v104_v13 }
  0xe0   :  { %114 = vadd.xlane.f32.xlu0 %v113_v14  ;;  %v127_v19 = vsel %vm112_vm1, %v123_v17, 0.0  ;;  %v302_v14 = vld [vmem:[%s630_s3 + $0x18] sm:$0xff] }
  0xe1   :  { %v124_v16 = vsel %vm112_vm1, %v122_v15, 0.0 }
  0xe2   :  { %125 = vadd.xlane.f32.xlu1 %v124_v16 }
  0xe4   :  { %117 = vadd.xlane.f32.xlu0 %v116_v18 }
  0xe6   :  { %128 = vadd.xlane.f32.xlu1 %v127_v19 }
 0x16d   :  { %v115_v26 = vpop.xlane.xlu0 %114 }
 0x16e   :  { %v120_v27 = vmul.f32 0.03125, %v115_v26 }
 0x16f   :  { %v126_v28 = vpop.xlane.xlu1 %125 }
 0x170   :  { %v132_v29 = vmul.f32 %v120_v27, %v120_v27  ;;  %v130_v30 = vmul.f32 0.03125, %v126_v28  ;;  %v138_v44 = vsub.f32 %v104_v13, %v120_v27  ;;  %v470_v13 = vpack.c.bf16 %v300_v11, %v299_v10 }
 0x171   :  { %v118_v31 = vpop.xlane.xlu0 %117 }
 0x172   :  { %v134_v32 = vsub.f32 %v130_v30, %v132_v29  ;;  %v121_v33 = vmul.f32 0.03125, %v118_v31  ;;  %471 = vmatprep.subr.bf16.mxu0 %v470_v13 }
 0x173   :  { %v129_v34 = vpop.xlane.xlu1 %128  ;;  %473 = vmatpush3.bf16.msra.mxu0 %v470_v13 }
 0x174   :  { %v136_v35 = vmax.f32 %v134_v32, 0.0  ;;  %v133_v36 = vmul.f32 %v121_v33, %v121_v33  ;;  %v131_v37 = vmul.f32 0.03125, %v129_v34  ;;  %v139_v49 = vsub.f32 %v109_v12, %v121_v33  ;;  %v301_v12 = vld [vmem:[%s630_s3 + $0x10] sm:$0xff]  ;;  %s513_s3 = smov [#allocation2]  }
 0x175   :  { %v474_v15 = vpack.c.bf16 %v302_v14, %v301_v12  ;;  %v285_v32 = vsub.s32 4, %v558_v6  ;;  %v291_v33 = vsub.s32 5, %v558_v6  ;;  %s396_s15 = sshll.u32 %s513_s3, 4  ;;  %s397_s15 = int_to_ptr.vmem [resolvable:$true] %s396_s15 }
 0x176   :  { %v140_v38 = vadd.f32 1e-05, %v136_v35  ;;  %v135_v39 = vsub.f32 %v131_v37, %v133_v36  ;;  %s489_s16 = scalar_lea.vmem %s397_s15, 256  ;;  %p494_p1 = scmp.lt.s32.totalorder %s397_s15, %s397_s15 }
 0x177   :  { %475 = vmatprep.subr.bf16.mxu0 %v474_v15  ;;  %v286_v35 = vrot.slane %v564_v8, %v285_v32  ;;  %p490_p0 = scmp.ne.s32.totalorder %s397_s15, %s489_s16  ;;  %p495_p2 = scmp.lt.s32.totalorder %s489_s16, %s489_s16 }
 0x178   :  { %481 = vrsqrt.f32 %v140_v38  ;;  %v137_v40 = vmax.f32 %v135_v39, 0.0  ;;  %477 = vmatpush3.bf16.msra.mxu0 %v474_v15 }
 0x179   :  { %p496_p3 = por %p495_p2, %p494_p1 }
 0x17a   :  { %v141_v41 = vadd.f32 1e-05, %v137_v40  ;;  %v292_v40 = vrot.slane %v564_v8, %v291_v33 }
 0x17b   :  { %p497_p4 = pnand %p496_p3, %p490_p0 }
 0x17c   :  { %483 = vrsqrt.f32 %v141_v41 }
 0x182   :  { %v482_v46 = vpop.eup %481 }
 0x183   :  { %v144_v47 = vmul.f32 %v482_v46, %v138_v44 }
 0x185   :  { %v150_v50 = vmul.f32 %v149_v45, %v144_v47 }
 0x186   :  { %v484_v51 = vpop.eup %483 }
 0x187   :  { %v145_v52 = vmul.f32 %v484_v51, %v139_v49  ;;  %v156_v53 = vadd.f32 %v155_v48, %v150_v50  ;;  %v305_v50 = vsub.s32 6, %v558_v6 }
 0x189   :  { %v151_v54 = vmul.f32 %v149_v45, %v145_v52  ;;  %v158_v55 = vmul.f32 0.01, %v156_v53  ;;  %v306_v51 = vrot.slane %v564_v8, %v305_v50 }
 0x18b   :  { %v157_v56 = vadd.f32 %v155_v48, %v151_v54  ;;  %v160_v57 = vmax.f32 %v156_v53, %v158_v55 }
 0x18d   :  { %444 = vmatprep.mubr.msk.f32.mxu1 %vm112_vm1, %v160_v57  ;;  %v159_v58 = vmul.f32 0.01, %v157_v56 }
 0x18f   :  { %v161_v59 = vmax.f32 %v157_v56, %v159_v58 }
 0x191   :  { %445 = vmatmul.mubr.msk.f32.vlgmr.msra.gmra.mrb[0].mxu1 %vm112_vm1, %v161_v59 }
 0x264   :  { %v446_v62 = vpop.f32.mrb[0].mxu1 }
 0x265   :  { %v248_v63 = vadd.f32 %v446_v62, %v169_v61  ;;  %v242_v0 = vpop.f32.mrb[1].mxu1 }
 0x266   :  { %v243_v1 = vadd.f32 %v242_v0, %v169_v61 }
 0x267   :  { %v254_v2 = vsel %vm112_vm1, %v248_v63, 0.0  ;;  %v260_v3 = vmul.f32 %v248_v63, %v248_v63 }
 0x268   :  { %255 = vadd.xlane.f32.xlu1 %v254_v2  ;;  %v251_v4 = vsel %vm112_vm1, %v243_v1, 0.0  ;;  %v259_v5 = vmul.f32 %v243_v1, %v243_v1 }
 0x269   :  { %252 = vadd.xlane.f32.xlu0 %v251_v4  ;;  %v264_v7 = vsel %vm112_vm1, %v260_v3, 0.0 }
 0x26a   :  { %v261_v9 = vsel %vm112_vm1, %v259_v5, 0.0 }
 0x26c   :  { %265 = vadd.xlane.f32.xlu1 %v264_v7 }
 0x26d   :  { %262 = vadd.xlane.f32.xlu0 %v261_v9 }
 0x2f5   :  { %v256_v16 = vpop.xlane.xlu1 %255 }
 0x2f6   :  { %v258_v17 = vmul.f32 0.03125, %v256_v16  ;;  %v253_v18 = vpop.xlane.xlu0 %252 }
 0x2f7   :  { %v257_v19 = vmul.f32 0.03125, %v253_v18 }
 0x2f8   :  { %v270_v21 = vmul.f32 %v258_v17, %v258_v17  ;;  %v276_v34 = vsub.f32 %v248_v63, %v258_v17 }
 0x2f9   :  { %v266_v20 = vpop.xlane.xlu1 %265  ;;  %v269_v24 = vmul.f32 %v257_v19, %v257_v19  ;;  %v275_v37 = vsub.f32 %v243_v1, %v257_v19 }
 0x2fa   :  { %v268_v22 = vmul.f32 0.03125, %v266_v20  ;;  %v263_v23 = vpop.xlane.xlu0 %262 }
 0x2fb   :  { %v267_v25 = vmul.f32 0.03125, %v263_v23 }
 0x2fc   :  { %v272_v26 = vsub.f32 %v268_v22, %v270_v21 }
 0x2fd   :  { %v271_v27 = vsub.f32 %v267_v25, %v269_v24 }
 0x2fe   :  { %v274_v28 = vmax.f32 %v272_v26, 0.0 }
 0x2ff   :  { %v273_v29 = vmax.f32 %v271_v27, 0.0 }
 0x300   :  { %v278_v30 = vadd.f32 1e-05, %v274_v28 }
 0x301   :  { %v277_v31 = vadd.f32 1e-05, %v273_v29 }
 0x302   :  { %485 = vrsqrt.f32 %v278_v30 }
 0x303   :  { %487 = vrsqrt.f32 %v277_v31 }
 0x30c   :  { %v486_v36 = vpop.eup %485 }
 0x30d   :  { %v488_v38 = vpop.eup %487  ;;  %v282_v39 = vmul.f32 %v486_v36, %v276_v34 }
 0x30e   :  { %v281_v41 = vmul.f32 %v488_v38, %v275_v37 }
 0x30f   :  { %v288_v42 = vmul.f32 %v286_v35, %v282_v39 }
 0x310   :  { %v287_v43 = vmul.f32 %v286_v35, %v281_v41 }
 0x311   :  { %v294_v44 = vadd.f32 %v292_v40, %v288_v42 }
 0x312   :  { %v293_v45 = vadd.f32 %v292_v40, %v287_v43 }
 0x313   :  { %v296_v46 = vmul.f32 0.01, %v294_v44 }
 0x314   :  { %v295_v47 = vmul.f32 0.01, %v293_v45 }
 0x315   :  { %v298_v49 = vmax.f32 %v294_v44, %v296_v46 }
 0x316   :  { %v297_v48 = vmax.f32 %v293_v45, %v295_v47 }
 0x318   :  { %455 = vmatprep.mubr.msk.f32.mxu0 %vm112_vm1, %v297_v48 }
 0x319   :  { %456 = vmatmul.mubr.msk.f32.vlgmr.msra.gmra.mrb[2].mxu0 %vm112_vm1, %v298_v49 }
 0x3ec   :  { %v457_v52 = vpop.f32.mrb[2].mxu0 }
 0x3ed   :  { %v385_v53 = vadd.f32 %v457_v52, %v306_v51  ;;  %v379_v54 = vpop.f32.mrb[3].mxu0 }
 0x3ee   :  { %v380_v55 = vadd.f32 %v379_v54, %v306_v51 }
 0x3ef   :  { %390 = vst.msk [vmem:[#allocation2 + $0x8] sm:$0xff] %vm388_vm2, %v385_v53 }
 0x3f0   :  { %389 = vst.msk [vmem:[#allocation2] sm:$0xff] %vm388_vm2, %v380_v55 }
 0x3f1   :  { %500 = shalt.err (!%p497_p4)
}
 0x3f2   :  { %s501_s19 = scalar_lea.hbm %s632_s5, 256 }
 0x3f3   :  { %p502_p5 = scmp.ne.s32.totalorder %s632_s5, %s501_s19  ;;  %p505_p6 = scmp.lt.u32.totalorder %s501_s19, %s632_s5 }
 0x3f5   :  { %p507_p7 = pnand %p505_p6, %p502_p5 }
 0x3f7   :  { %510 = shalt.err (!%p507_p7)
}
 0x3f8   :  { %s514_s24 = smov 128   ;;  %s515_s25 = smov 8  }
 0x3f9   :  { %402 = dma.vmem_to_hbm [thread:$0]  %s397_s15, 256, %s632_s5, [#allocation3], %s514_s24, %s514_s24, %s515_s25  }
 0x3fa   :  { %511 = dma.done.wait [#allocation3], 256  }
 0x3fb   :  { %512 = vsyncadd [#allocation3], 4294967040 }
 0x3fc   :  { %406 = vsyncpa [#allocation3], 1 }

</bundles_post_ra>
